<compile_context>
chip_gen: v5e
topology: v5e:2x2
jax: 0.10.0
libtpu: 0.0.40
codegen_flags: <defaults>
</compile_context>

<pallas_src>
import functools
import math

import jax
import jax.numpy as jnp
from jax import lax
from jax.experimental import pallas as pl
from jax.experimental.pallas import tpu as pltpu


# ----------------------------------------------------------------------------
# Pallas kernel (fused k-step spatial GCN + temporal linear head)
# ----------------------------------------------------------------------------
def _stgan_kernel(h0_ref, a_ref, wblk_ref, bias_ref, wsel_ref, whead_ref,
                  hist_ref, mlpb_ref, o_ref,
                  hw_scr, hnext_scr, acc_scr,
                  *, k_steps: int, row_tile: int, src_tile: int):
    """Grid: (k_steps, n_row_tiles, n_src_tiles); src is the reduction axis.

    h0_ref   : (N_pad, B*Fe)  f32   last-step exogenous features, all batches
    a_ref    : (TN, TS)       bf16  tile of D^-1/2 (A+I) D^-1/2
    wblk_ref : (B*Fe, B*Fe)   bf16  kron(I_B, fc_w^T)
    bias_ref : (1, B*Fe)      f32   GCN bias tiled across batches
    wsel_ref : (B, B*Fe)      bf16  kron(I_B, head weights at last-step exog)
    whead_ref: (B, B*T*F)     bf16  kron(I_B, flattened head weights)
    hist_ref : (B*T*F, TN)    bf16  lane-dense history tile (final step only)
    mlpb_ref : (1, 1)         f32   head bias (SMEM)
    o_ref    : (B, TN)        f32
    hw_scr   : (N_pad, B*Fe)  bf16  h_s @ kron(I_B, W^T), rebuilt each step
    hnext_scr: (N_pad, B*Fe)  f32   h_{s+1} slab, resident across the grid
    acc_scr  : (TN, B*Fe)     f32   per-row-tile accumulator over src tiles
    """
    s = pl.program_id(0)
    i = pl.program_id(1)
    j = pl.program_id(2)
    n_src = pl.num_programs(2)
    last_step = k_steps - 1

    row0 = pl.multiple_of(i * row_tile, row_tile)
    src0 = pl.multiple_of(j * src_tile, src_tile)

    # ---- one-time init: h_0 into the resident slab --------------------------
    @pl.when((s == 0) & (i == 0) & (j == 0))
    def _():
        hnext_scr[...] = h0_ref[...]

    # ---- step prologue: hw = h_s @ kron(I_B, W^T), whole slab, once per step
    @pl.when((i == 0) & (j == 0))
    def _():
        hw_scr[...] = jnp.dot(
            hnext_scr[...].astype(jnp.bfloat16), wblk_ref[...],
            preferred_element_type=jnp.float32).astype(jnp.bfloat16)

    # ---- accumulate A[row tile, src tile] @ hw[src tile] --------------------
    @pl.when(j == 0)
    def _():
        acc_scr[...] = jnp.zeros_like(acc_scr)

    acc_scr[...] += jnp.dot(a_ref[...], hw_scr[pl.ds(src0, src_tile), :],
                            preferred_element_type=jnp.float32)

    # ---- row tile finished for this step ------------------------------------
    @pl.when(j == n_src - 1)
    def _():
        h_new = acc_scr[...] + bias_ref[...]                    # (TN, B*Fe) f32
        hnext_scr[pl.ds(row0, row_tile), :] = h_new

        @pl.when(s == last_step)
        def _():
            # Head correction by linearity: <h_k - h_0, w_slice> per node.
            delta = (h_new - h0_ref[pl.ds(row0, row_tile), :]).astype(jnp.bfloat16)
            dcon = lax.dot_general(                             # (B, TN), NT matmul
                wsel_ref[...], delta,
                dimension_numbers=(((1,), (1,)), ((), ())),
                preferred_element_type=jnp.float32)
            # Base head term: one MXU matmul on the lane-dense history slab.
            base = jnp.dot(whead_ref[...], hist_ref[...],
                           preferred_element_type=jnp.float32)  # (B, TN)
            o_ref[...] = (base + dcon + mlpb_ref[0, 0]).astype(o_ref.dtype)


# ----------------------------------------------------------------------------
# Glue (plain JAX) -- dense normalized adjacency from edge_index
# ----------------------------------------------------------------------------
def build_norm_adj(edge_index, num_nodes, dtype=jnp.float32):
    """Dense D^-1/2 (A + I) D^-1/2, matching add_self_loops + degree(col) + norm."""
    row, col = edge_index[0], edge_index[1]
    loops = jnp.arange(num_nodes, dtype=edge_index.dtype)
    row = jnp.concatenate([row, loops])
    col = jnp.concatenate([col, loops])
    deg = jnp.zeros((num_nodes,), dtype).at[col].add(jnp.ones_like(col, dtype))
    deg_inv_sqrt = jnp.where(deg > 0, lax.rsqrt(deg), 0.0)
    norm = deg_inv_sqrt[row] * deg_inv_sqrt[col]
    # out[c] += norm * x[r]  =>  A_hat[c, r] += norm
    A = jnp.zeros((num_nodes, num_nodes), dtype).at[col, row].add(norm)
    return A


# ----------------------------------------------------------------------------
# Forward wrapper
# ----------------------------------------------------------------------------
def stgan_forward(history, horizon, edge_index, params, *, k_steps, exog,
                  row_tile=128, src_tile=128, min_nodes_pad=128):
    del horizon  # TODO(synk): identity FeatureEncoder placeholder ignores it.
    assert k_steps >= 1
    assert row_tile % 128 == 0 and src_tile % 128 == 0
    B, T, N, F = history.shape
    Fe = exog
    out_dtype = history.dtype
    f32, bf16 = jnp.float32, jnp.bfloat16

    # TODO(synk): FeatureEncoder class is not provided in the reference source;
    #             an identity encoder is assumed (x == history).
    # TODO(synk): the temporal MLP class is not provided; a single linear head
    #             over the flattened (T, F) window is assumed, which is what
    #             lets the head be folded in by linearity.

    tile = math.lcm(row_tile, src_tile)
    N_pad = -(-max(N, min_nodes_pad) // tile) * tile
    n_row, n_src = N_pad // row_tile, N_pad // src_tile
    BF, BTF = B * Fe, B * T * F

    # Dense normalized adjacency, zero-padded so padded nodes never feed real
    # nodes; bf16 operands for the MXU (f32 accumulation inside the kernel).
    A = build_norm_adj(edge_index, N, f32)
    A_pad = jnp.zeros((N_pad, N_pad), f32).at[:N, :N].set(A).astype(bf16)

    # Last-step exogenous node features, laid out (N_pad, B*Fe).
    h0 = jnp.transpose(history[:, -1, :, F - Fe:].astype(f32), (1, 0, 2))
    h0_pad = jnp.zeros((N_pad, BF), f32).at[:N, :].set(h0.reshape(N, BF))

    # Loop-invariant parameter packing (hoisted out of the kernel / k-loop).
    # TODO(synk): kron(I_B, .) costs O(B^2); switch to a per-batch (Fe, Fe)
    #             layout once B*Fe grows past a few hundred lanes.
    w_blk = jnp.kron(jnp.eye(B, dtype=f32), params["fc_w"].T.astype(f32)).astype(bf16)
    bias_tiled = jnp.tile(params["bias"].reshape(1, Fe).astype(f32), (1, B))
    w_flat = params["mlp_w"].reshape(T * F).astype(f32)
    w_head_blk = jnp.kron(jnp.eye(B, dtype=f32), w_flat[None, :]).astype(bf16)
    w_slice = params["mlp_w"].reshape(T, F)[T - 1, F - Fe:].astype(f32)
    w_sel = jnp.kron(jnp.eye(B, dtype=f32), w_slice[None, :]).astype(bf16)
    mlp_b = params["mlp_b"].reshape(1, 1).astype(f32)

    # Lane-dense history slab (B*T*F, N_pad): N on the 128-lane axis so the
    # temporal head runs on the MXU instead of VPU mul + XLU reductions.
    hist = jnp.transpose(history.astype(f32), (0, 1, 3, 2)).reshape(BTF, N)
    hist_pad = jnp.zeros((BTF, N_pad), f32).at[:, :N].set(hist).astype(bf16)

    last_step = k_steps - 1
    const = lambda s, i, j: (0, 0)
    # History / output blocks follow the row tile only on the final step;
    # otherwise they stay pinned to block 0 (no redundant DMA / writeback).
    final_row = lambda s, i, j: (0, jnp.where(s == last_step, i, 0))

    grid_spec = pltpu.PrefetchScalarGridSpec(
        num_scalar_prefetch=0,
        grid=(k_steps, n_row, n_src),
        in_specs=[
            pl.BlockSpec((N_pad, BF), const),                            # h0
            pl.BlockSpec((row_tile, src_tile), lambda s, i, j: (i, j)),  # A
            pl.BlockSpec((BF, BF), const),                               # w_blk
            pl.BlockSpec((1, BF), const),                                # bias
            pl.BlockSpec((B, BF), const),                                # w_sel
            pl.BlockSpec((B, BTF), const),                               # w_head_blk
            pl.BlockSpec((BTF, row_tile), final_row),                    # history
            pl.BlockSpec(memory_space=pltpu.MemorySpace.SMEM),           # mlp_b
        ],
        out_specs=pl.BlockSpec((B, row_tile), final_row),
        scratch_shapes=[
            pltpu.VMEM((N_pad, BF), bf16),     # hw = h_s @ kron(I_B, W^T)
            pltpu.VMEM((N_pad, BF), f32),      # h_{s+1} slab (resident)
            pltpu.VMEM((row_tile, BF), f32),   # per-row-tile accumulator
        ],
    )

    kernel = functools.partial(_stgan_kernel, k_steps=k_steps,
                               row_tile=row_tile, src_tile=src_tile)
    out = pl.pallas_call(
        kernel,
        out_shape=jax.ShapeDtypeStruct((B, N_pad), f32),
        grid_spec=grid_spec,
        compiler_params=pltpu.CompilerParams(
            # The step/src axes carry the resident h slab + accumulator, and
            # each row tile writes rows other tiles read next step, so all
            # three axes must stay on one core.
            # TODO(synk): for v7x's 2nd TensorCore, hoist the head matmul onto
            #             its own parallel-over-N grid axis (or a second call).
            dimension_semantics=("arbitrary", "arbitrary", "arbitrary"),
            vmem_limit_bytes=48 * 1024 * 1024,   # within v7x's 64 MiB budget
        ),
    )(h0_pad, A_pad, w_blk, bias_tiled, w_sel, w_head_blk, hist_pad, mlp_b)
    return out[:, :N].astype(out_dtype)


# Pure-JAX (unfused, f32) reference replicating the module's forward.
def stgan_forward_ref(history, horizon, edge_index, params, *, k_steps, exog):
    B, T, N, F = history.shape
    x = history
    h = x[:, -1, :, -exog:]
    A = build_norm_adj(edge_index, N, history.dtype)
    for _ in range(k_steps):
        hw = jnp.einsum("bnf,gf->bng", h, params["fc_w"])
        h = jnp.einsum("mn,bnf->bmf", A, hw) + params["bias"]
    x = x.at[:, -1, :, -exog:].set(h)
    x_flat = jnp.transpose(x, (0, 2, 1, 3)).reshape(B * N, T * F)
    out = x_flat @ params["mlp_w"] + params["mlp_b"]
    return out.reshape(B, N)


# ----------------------------------------------------------------------------
# Main
# ----------------------------------------------------------------------------
if __name__ == "__main__":
    B, T, N = 2, 8, 8
    STATIC, EXOG = 2, 4
    F = STATIC + EXOG
    HORIZON = 2
    K_STEPS = 2
    dtype = jnp.float32

    key = jax.random.PRNGKey(0)
    k_hist, k_hor, k_fc, k_b, k_mw, k_mb = jax.random.split(key, 6)

    history = jax.random.normal(k_hist, (B, T, N, F), dtype)
    horizon = jax.random.normal(k_hor, (B, HORIZON, N, F), dtype)

    # Ring graph (both directions), edge_index: (2, 2N)
    src = jnp.arange(N, dtype=jnp.int32)
    dst = (src + 1) % N
    edge_index = jnp.stack(
        [jnp.concatenate([src, dst]), jnp.concatenate([dst, src])], axis=0)

    params = {
        "fc_w": jax.random.normal(k_fc, (EXOG, EXOG), dtype) / jnp.sqrt(EXOG),
        "bias": jax.random.normal(k_b, (1, EXOG), dtype) * 0.1,
        "mlp_w": jax.random.normal(k_mw, (T * F, 1), dtype) / jnp.sqrt(T * F),
        "mlp_b": jax.random.normal(k_mb, (1, 1), dtype) * 0.1,
    }

    ref = stgan_forward_ref(history, horizon, edge_index, params,
                            k_steps=K_STEPS, exog=EXOG)

    # Run 1: default padding (single (row, src) tile, grid = (k, 1, 1)).
    out1 = jax.block_until_ready(
        stgan_forward(history, horizon, edge_index, params,
                      k_steps=K_STEPS, exog=EXOG))
    # Run 2: forced 256-node padding -> 2x2 A tiles, exercising the streamed
    # src-accumulation axis and per-row-tile history/head/output blocks.
    out2 = jax.block_until_ready(
        stgan_forward(history, horizon, edge_index, params,
                      k_steps=K_STEPS, exog=EXOG, min_nodes_pad=256))

    assert out1.shape == (B, N) and out2.shape == (B, N)
    # bf16 MXU operands with f32 accumulation -> tolerance loosened from the
    # pure-f32 1e-4 (per review); structural errors would be O(1).
    assert jnp.allclose(out1, ref, atol=5e-2, rtol=5e-2), (out1, ref)
    assert jnp.allclose(out2, ref, atol=5e-2, rtol=5e-2), (out2, ref)
    assert jnp.allclose(out1, out2, atol=5e-3, rtol=5e-3), (out1, out2)

    print("KERNEL_OK")
</pallas_src>

<mosaic_0001>
module attributes {stable_mosaic.version = 11 : i64} {
  func.func @_stgan_kernel(%arg0: i32, %arg1: i32, %arg2: i32, %arg3: memref<128x8xf32, #tpu.memory_space<vmem>>, %arg4: memref<128x128xbf16, #tpu.memory_space<vmem>>, %arg5: memref<8x8xbf16, #tpu.memory_space<vmem>>, %arg6: memref<1x8xf32, #tpu.memory_space<vmem>>, %arg7: memref<2x8xbf16, #tpu.memory_space<vmem>>, %arg8: memref<2x96xbf16, #tpu.memory_space<vmem>>, %arg9: memref<96x128xbf16, #tpu.memory_space<vmem>>, %arg10: memref<1x1xf32, #tpu.memory_space<smem>>, %arg11: memref<2x128xf32, #tpu.memory_space<vmem>>, %arg12: memref<128x8xbf16, #tpu.memory_space<vmem>>, %arg13: memref<128x8xf32, #tpu.memory_space<vmem>>, %arg14: memref<128x8xf32, #tpu.memory_space<vmem>>) attributes {dimension_semantics = [#tpu.dimension_semantics<arbitrary>, #tpu.dimension_semantics<arbitrary>, #tpu.dimension_semantics<arbitrary>], iteration_bounds = array<i64: 2, 1, 1>, scalar_prefetch = 0 : i64, scratch_operands = 3 : i64, tpu.core_type = #tpu.core_type<tc>, window_params = [{pipeline_mode = #tpu.pipeline_mode<synchronous>, transform_indices = @transform_0, window_bounds = array<i64: 128, 8>}, {transform_indices = @transform_1, window_bounds = array<i64: 128, 128>}, {pipeline_mode = #tpu.pipeline_mode<synchronous>, transform_indices = @transform_2, window_bounds = array<i64: 8, 8>}, {pipeline_mode = #tpu.pipeline_mode<synchronous>, transform_indices = @transform_3, window_bounds = array<i64: 1, 8>}, {pipeline_mode = #tpu.pipeline_mode<synchronous>, transform_indices = @transform_4, window_bounds = array<i64: 2, 8>}, {pipeline_mode = #tpu.pipeline_mode<synchronous>, transform_indices = @transform_5, window_bounds = array<i64: 2, 96>}, {transform_indices = @transform_6, window_bounds = array<i64: 96, 128>}, {transform_indices = @transform_7, window_bounds = array<i64: 1, 1>}, {transform_indices = @transform_8, window_bounds = array<i64: 2, 128>}]} {
    %c128_i32 = arith.constant 128 : i32
    %0 = arith.muli %arg1, %c128_i32 : i32
    %1 = tpu.assume_multiple %0, 128 : i32
    %c128_i32_0 = arith.constant 128 : i32
    %2 = arith.muli %arg2, %c128_i32_0 : i32
    %3 = tpu.assume_multiple %2, 128 : i32
    %c0_i32 = arith.constant 0 : i32
    %4 = arith.cmpi eq, %arg0, %c0_i32 : i32
    %c0_i32_1 = arith.constant 0 : i32
    %5 = arith.cmpi eq, %arg1, %c0_i32_1 : i32
    %6 = arith.andi %4, %5 : i1
    %c0_i32_2 = arith.constant 0 : i32
    %7 = arith.cmpi eq, %arg2, %c0_i32_2 : i32
    %8 = arith.andi %6, %7 : i1
    %9 = arith.extui %8 : i1 to i32
    %c0_i32_3 = arith.constant 0 : i32
    %10 = arith.cmpi ne, %9, %c0_i32_3 : i32
    scf.if %10 {
      %c0_17 = arith.constant 0 : index
      %c0_18 = arith.constant 0 : index
      %29 = vector.load %arg3[%c0_17, %c0_18] : memref<128x8xf32, #tpu.memory_space<vmem>>, vector<128x8xf32>
      %c0_19 = arith.constant 0 : index
      %c0_20 = arith.constant 0 : index
      %30 = vector.load %arg13[%c0_19, %c0_20] : memref<128x8xf32, #tpu.memory_space<vmem>>, vector<128x8xf32>
      tpu.vector_store %arg13[%c0_19, %c0_20], %29 {strides = array<i32>} : memref<128x8xf32, #tpu.memory_space<vmem>>, vector<128x8xf32>,
    } else {
    }
    %c0_i32_4 = arith.constant 0 : i32
    %11 = arith.cmpi eq, %arg1, %c0_i32_4 : i32
    %c0_i32_5 = arith.constant 0 : i32
    %12 = arith.cmpi eq, %arg2, %c0_i32_5 : i32
    %13 = arith.andi %11, %12 : i1
    %14 = arith.extui %13 : i1 to i32
    %c0_i32_6 = arith.constant 0 : i32
    %15 = arith.cmpi ne, %14, %c0_i32_6 : i32
    scf.if %15 {
      %c0_17 = arith.constant 0 : index
      %c0_18 = arith.constant 0 : index
      %29 = vector.load %arg13[%c0_17, %c0_18] : memref<128x8xf32, #tpu.memory_space<vmem>>, vector<128x8xf32>
      %30 = arith.truncf %29 : vector<128x8xf32> to vector<128x8xbf16>
      %c0_19 = arith.constant 0 : index
      %c0_20 = arith.constant 0 : index
      %31 = vector.load %arg5[%c0_19, %c0_20] : memref<8x8xbf16, #tpu.memory_space<vmem>>, vector<8x8xbf16>
      %cst_21 = arith.constant dense<0.000000e+00> : vector<128x8xf32>
      %32 = tpu.matmul %30, %31, %cst_21 {dimension_numbers = #tpu.dot_dimension_numbers<[1], [0], [0], [1], [0, 0, 1, 1], [], []>} : vector<128x8xbf16>, vector<8x8xbf16>, vector<128x8xf32> -> vector<128x8xf32>
      %33 = arith.truncf %32 : vector<128x8xf32> to vector<128x8xbf16>
      %c0_22 = arith.constant 0 : index
      %c0_23 = arith.constant 0 : index
      %34 = vector.load %arg12[%c0_22, %c0_23] : memref<128x8xbf16, #tpu.memory_space<vmem>>, vector<128x8xbf16>
      tpu.vector_store %arg12[%c0_22, %c0_23], %33 {strides = array<i32>} : memref<128x8xbf16, #tpu.memory_space<vmem>>, vector<128x8xbf16>,
    } else {
    }
    %c0_i32_7 = arith.constant 0 : i32
    %16 = arith.cmpi eq, %arg2, %c0_i32_7 : i32
    %17 = arith.extui %16 : i1 to i32
    %c0_i32_8 = arith.constant 0 : i32
    %18 = arith.cmpi ne, %17, %c0_i32_8 : i32
    scf.if %18 {
      %cst_17 = arith.constant 0.000000e+00 : f32
      %29 = vector.broadcast %cst_17 : f32 to vector<128x8xf32>
      %c0_18 = arith.constant 0 : index
      %c0_19 = arith.constant 0 : index
      %30 = vector.load %arg14[%c0_18, %c0_19] : memref<128x8xf32, #tpu.memory_space<vmem>>, vector<128x8xf32>
      tpu.vector_store %arg14[%c0_18, %c0_19], %29 {strides = array<i32>} : memref<128x8xf32, #tpu.memory_space<vmem>>, vector<128x8xf32>,
    } else {
    }
    %c0 = arith.constant 0 : index
    %c0_9 = arith.constant 0 : index
    %19 = vector.load %arg14[%c0, %c0_9] : memref<128x8xf32, #tpu.memory_space<vmem>>, vector<128x8xf32>
    %c0_10 = arith.constant 0 : index
    %c0_11 = arith.constant 0 : index
    %20 = vector.load %arg4[%c0_10, %c0_11] : memref<128x128xbf16, #tpu.memory_space<vmem>>, vector<128x128xbf16>
    %21 = arith.index_cast %3 : i32 to index
    %c0_12 = arith.constant 0 : index
    %22 = vector.load %arg12[%21, %c0_12] : memref<128x8xbf16, #tpu.memory_space<vmem>>, vector<128x8xbf16>
    %cst = arith.constant dense<0.000000e+00> : vector<128x8xf32>
    %23 = tpu.matmul %20, %22, %cst {dimension_numbers = #tpu.dot_dimension_numbers<[1], [0], [0], [1], [0, 0, 1, 1], [], []>} : vector<128x128xbf16>, vector<128x8xbf16>, vector<128x8xf32> -> vector<128x8xf32>
    %24 = arith.addf %19, %23 : vector<128x8xf32>
    %c0_13 = arith.constant 0 : index
    %c0_14 = arith.constant 0 : index
    %25 = vector.load %arg14[%c0_13, %c0_14] : memref<128x8xf32, #tpu.memory_space<vmem>>, vector<128x8xf32>
    tpu.vector_store %arg14[%c0_13, %c0_14], %24 {strides = array<i32>} : memref<128x8xf32, #tpu.memory_space<vmem>>, vector<128x8xf32>,
    %c0_i32_15 = arith.constant 0 : i32
    %26 = arith.cmpi eq, %arg2, %c0_i32_15 : i32
    %27 = arith.extui %26 : i1 to i32
    %c0_i32_16 = arith.constant 0 : i32
    %28 = arith.cmpi ne, %27, %c0_i32_16 : i32
    scf.if %28 {
      %c0_17 = arith.constant 0 : index
      %c0_18 = arith.constant 0 : index
      %29 = vector.load %arg14[%c0_17, %c0_18] : memref<128x8xf32, #tpu.memory_space<vmem>>, vector<128x8xf32>
      %c0_19 = arith.constant 0 : index
      %c0_20 = arith.constant 0 : index
      %30 = vector.load %arg6[%c0_19, %c0_20] : memref<1x8xf32, #tpu.memory_space<vmem>>, vector<1x8xf32>
      %31 = vector.broadcast %30 : vector<1x8xf32> to vector<128x8xf32>
      %32 = arith.addf %29, %31 : vector<128x8xf32>
      %33 = arith.index_cast %1 : i32 to index
      %c0_21 = arith.constant 0 : index
      %34 = vector.load %arg13[%33, %c0_21] : memref<128x8xf32, #tpu.memory_space<vmem>>, vector<128x8xf32>
      tpu.vector_store %arg13[%33, %c0_21], %32 {strides = array<i32>} : memref<128x8xf32, #tpu.memory_space<vmem>>, vector<128x8xf32>,
      %c1_i32 = arith.constant 1 : i32
      %35 = arith.cmpi eq, %arg0, %c1_i32 : i32
      %36 = arith.extui %35 : i1 to i32
      %c0_i32_22 = arith.constant 0 : i32
      %37 = arith.cmpi ne, %36, %c0_i32_22 : i32
      scf.if %37 {
        %38 = arith.index_cast %1 : i32 to index
        %c0_23 = arith.constant 0 : index
        %39 = vector.load %arg3[%38, %c0_23] : memref<128x8xf32, #tpu.memory_space<vmem>>, vector<128x8xf32>
        %40 = arith.subf %32, %39 : vector<128x8xf32>
        %41 = arith.truncf %40 : vector<128x8xf32> to vector<128x8xbf16>
        %c0_24 = arith.constant 0 : index
        %c0_25 = arith.constant 0 : index
        %42 = vector.load %arg7[%c0_24, %c0_25] : memref<2x8xbf16, #tpu.memory_space<vmem>>, vector<2x8xbf16>
        %cst_26 = arith.constant dense<0.000000e+00> : vector<2x128xf32>
        %43 = tpu.matmul %42, %41, %cst_26 {dimension_numbers = #tpu.dot_dimension_numbers<[1], [1], [0], [0], [0, 0, 1, 0], [], []>} : vector<2x8xbf16>, vector<128x8xbf16>, vector<2x128xf32> -> vector<2x128xf32>
        %c0_27 = arith.constant 0 : index
        %c0_28 = arith.constant 0 : index
        %44 = vector.load %arg8[%c0_27, %c0_28] : memref<2x96xbf16, #tpu.memory_space<vmem>>, vector<2x96xbf16>
        %c0_29 = arith.constant 0 : index
        %c0_30 = arith.constant 0 : index
        %45 = vector.load %arg9[%c0_29, %c0_30] : memref<96x128xbf16, #tpu.memory_space<vmem>>, vector<96x128xbf16>
        %cst_31 = arith.constant dense<0.000000e+00> : vector<2x128xf32>
        %46 = tpu.matmul %44, %45, %cst_31 {dimension_numbers = #tpu.dot_dimension_numbers<[1], [0], [0], [1], [0, 0, 1, 1], [], []>} : vector<2x96xbf16>, vector<96x128xbf16>, vector<2x128xf32> -> vector<2x128xf32>
        %47 = arith.addf %46, %43 : vector<2x128xf32>
        %c0_32 = arith.constant 0 : index
        %c0_33 = arith.constant 0 : index
        %48 = memref.load %arg10[%c0_32, %c0_33] : memref<1x1xf32, #tpu.memory_space<smem>>
        %49 = vector.broadcast %48 : f32 to vector<2x128xf32>
        %50 = arith.addf %47, %49 : vector<2x128xf32>
        %c0_34 = arith.constant 0 : index
        %c0_35 = arith.constant 0 : index
        %51 = vector.load %arg11[%c0_34, %c0_35] : memref<2x128xf32, #tpu.memory_space<vmem>>, vector<2x128xf32>
        tpu.vector_store %arg11[%c0_34, %c0_35], %50 {strides = array<i32>} : memref<2x128xf32, #tpu.memory_space<vmem>>, vector<2x128xf32>,
      } else {
      }
    } else {
    }
    return
  }
  func.func @transform_0(%arg0: i32, %arg1: i32, %arg2: i32) -> (i32, i32) {
    %c0_i32 = arith.constant 0 : i32
    %c0_i32_0 = arith.constant 0 : i32
    %c0_i32_1 = arith.constant 0 : i32
    return %c0_i32, %c0_i32_0 : i32, i32
  }
  func.func @transform_1(%arg0: i32, %arg1: i32, %arg2: i32) -> (i32, i32) {
    %c0_i32 = arith.constant 0 : i32
    return %arg1, %arg2 : i32, i32
  }
  func.func @transform_2(%arg0: i32, %arg1: i32, %arg2: i32) -> (i32, i32) {
    %c0_i32 = arith.constant 0 : i32
    %c0_i32_0 = arith.constant 0 : i32
    %c0_i32_1 = arith.constant 0 : i32
    return %c0_i32, %c0_i32_0 : i32, i32
  }
  func.func @transform_3(%arg0: i32, %arg1: i32, %arg2: i32) -> (i32, i32) {
    %c0_i32 = arith.constant 0 : i32
    %c0_i32_0 = arith.constant 0 : i32
    %c0_i32_1 = arith.constant 0 : i32
    return %c0_i32, %c0_i32_0 : i32, i32
  }
  func.func @transform_4(%arg0: i32, %arg1: i32, %arg2: i32) -> (i32, i32) {
    %c0_i32 = arith.constant 0 : i32
    %c0_i32_0 = arith.constant 0 : i32
    %c0_i32_1 = arith.constant 0 : i32
    return %c0_i32, %c0_i32_0 : i32, i32
  }
  func.func @transform_5(%arg0: i32, %arg1: i32, %arg2: i32) -> (i32, i32) {
    %c0_i32 = arith.constant 0 : i32
    %c0_i32_0 = arith.constant 0 : i32
    %c0_i32_1 = arith.constant 0 : i32
    return %c0_i32, %c0_i32_0 : i32, i32
  }
  func.func @transform_6(%arg0: i32, %arg1: i32, %arg2: i32) -> (i32, i32) {
    %c1_i32 = arith.constant 1 : i32
    %0 = arith.cmpi eq, %arg0, %c1_i32 : i32
    %c0_i32 = arith.constant 0 : i32
    %1 = arith.select %0, %arg1, %c0_i32 : i32
    %c0_i32_0 = arith.constant 0 : i32
    %c0_i32_1 = arith.constant 0 : i32
    return %c0_i32_0, %1 : i32, i32
  }
  func.func @transform_7(%arg0: i32, %arg1: i32, %arg2: i32) -> (i32, i32) {
    %c0_i32 = arith.constant 0 : i32
    %c0_i32_0 = arith.constant 0 : i32
    %c0_i32_1 = arith.constant 0 : i32
    return %c0_i32, %c0_i32_0 : i32, i32
  }
  func.func @transform_8(%arg0: i32, %arg1: i32, %arg2: i32) -> (i32, i32) {
    %c1_i32 = arith.constant 1 : i32
    %0 = arith.cmpi eq, %arg0, %c1_i32 : i32
    %c0_i32 = arith.constant 0 : i32
    %1 = arith.select %0, %arg1, %c0_i32 : i32
    %c0_i32_0 = arith.constant 0 : i32
    %c0_i32_1 = arith.constant 0 : i32
    return %c0_i32_0, %1 : i32, i32
  }
}

</mosaic_0001>

<bundles_post_ra>
// kernel: tpu_custom_call.1
= control target key start
LH: loop header
LB: loop body
LE: loop exit
PB: predicated region body
PF: predicated region fallthrough
CT: control target
= control target key end

     0   :  { %s1772_s0 = inlined_call_operand.vmem [shape: f32[128,8], index: 0, kind: input, shape index: {}]   ;;  %s1773_s1 = inlined_call_operand.vmem [shape: bf16[128,128], index: 1, kind: input, shape index: {}]   ;;  %s1774_s2 = inlined_call_operand.vmem [shape: bf16[8,8], index: 2, kind: input, shape index: {}]   ;;  %s1775_s3 = inlined_call_operand.vmem [shape: f32[1,8], index: 3, kind: input, shape index: {}]   ;;  %s1776_s4 = inlined_call_operand.vmem [shape: bf16[2,8], index: 4, kind: input, shape index: {}]   ;;  %s1777_s5 = inlined_call_operand.vmem [shape: bf16[2,96], index: 5, kind: input, shape index: {}]   ;;  %s1778_s6 = inlined_call_operand.vmem [shape: bf16[96,128], index: 6, kind: input, shape index: {}]   ;;  %s1779_s7 = inlined_call_operand.<no memory space> [shape: f32[1,1], index: 7, kind: input, shape index: {}]   ;;  %s1780_s8 = inlined_call_operand.hbm [shape: f32[2,128], index: 8, kind: output, shape index: {}]  }
   0x1   :  { %13 = sst [smem:[#allocation5]] %s1779_s7 }
   0x2   :  { %14 = vsyncpa [#allocation7], 0 }
   0x3   :  { %16 = vsyncpa [#allocation7 + $0x1], 0  ;;  %s1422_s29 = smov 0   ;;  %s1424_s30 = smov 0  }
   0x4   :  { %s1426_s9 = smov 0  }
   0x5 LB: > { %s1133_s7 = sadd.s32 4294967295, %s1370_s9   ;;  %s1134_s10 = sadd.s32 4294967294, %s1370_s9   ;;  %s1370_s9 = sphi %s1426_s9, %s22_s9   ;;  %s1366_s30 = sphi %s1424_s30, %s1782_s30   ;;  %s1362_s29 = sphi %s1422_s29, %s1781_s29  }
   0x6   : > { %s41_s11 = sadd.s32 1, %s1366_s30  ;;  %p1139_p0 = scmp.ge.s32.totalorder %s1370_s9, 1 }
   0x7   : > { %p43_p1 = scmp.ge.s32.totalorder %s41_s11, 2  ;;  %p312_p2 = scmp.lt.s32.totalorder %s1370_s9, 3 }
   0x9   : > { %s1784_s11 = smov (%p43_p1, %s41_s11), 0  ;;  %p313_p3 = pnand %p1139_p0, %p312_p2 }
   0xa   : > { %p377_p4 = scmp.eq.s32.totalorder (!%p313_p3), %s1362_s29, 0 }
   0xb   : > { %316 = sbr.rel (%p313_p3) target bundleno = 675 (0x2a3), region = 52 }
  0x10   : > { %385 = sbr.rel (!%p377_p4) target bundleno = 33 (0x21), region = 56  ;;  %v386_v0 = vld [vmem:[%s1772_s0] sm:$0xff] (%p377_p4)  ;;  %vm402_vm0 = vcmask (%p377_p4), 64512   ;;  %v387_v1 = vld [vmem:[%s1772_s0 + $0x8] sm:$0xff] (%p377_p4)  ;;  %v388_v2 = vld [vmem:[%s1772_s0 + $0x10] sm:$0xff] (%p377_p4) }
  0x11   : > { %403 = vst.msk [vmem:[#allocation3] sm:$0xff] (%p377_p4), %vm402_vm0, %v386_v0  ;;  %v389_v3 = vld [vmem:[%s1772_s0 + $0x18] sm:$0xff] (%p377_p4)  ;;  %v390_v4 = vld [vmem:[%s1772_s0 + $0x20] sm:$0xff] (%p377_p4)  ;;  %v391_v5 = vld [vmem:[%s1772_s0 + $0x28] sm:$0xff] (%p377_p4) }
  0x12   : > { %404 = vst.msk [vmem:[#allocation3 + $0x8] sm:$0xff] (%p377_p4), %vm402_vm0, %v387_v1  ;;  %v392_v6 = vld [vmem:[%s1772_s0 + $0x30] sm:$0xff] (%p377_p4)  ;;  %v393_v7 = vld [vmem:[%s1772_s0 + $0x38] sm:$0xff] (%p377_p4)  ;;  %v394_v8 = vld [vmem:[%s1772_s0 + $0x40] sm:$0xff] (%p377_p4) }
  0x13   : > { %405 = vst.msk [vmem:[#allocation3 + $0x10] sm:$0xff] (%p377_p4), %vm402_vm0, %v388_v2  ;;  %v395_v9 = vld [vmem:[%s1772_s0 + $0x48] sm:$0xff] (%p377_p4)  ;;  %v396_v10 = vld [vmem:[%s1772_s0 + $0x50] sm:$0xff] (%p377_p4)  ;;  %v397_v11 = vld [vmem:[%s1772_s0 + $0x58] sm:$0xff] (%p377_p4) }
  0x14   : > { %406 = vst.msk [vmem:[#allocation3 + $0x18] sm:$0xff] (%p377_p4), %vm402_vm0, %v389_v3  ;;  %v398_v12 = vld [vmem:[%s1772_s0 + $0x60] sm:$0xff] (%p377_p4)  ;;  %v399_v13 = vld [vmem:[%s1772_s0 + $0x68] sm:$0xff] (%p377_p4)  ;;  %v400_v14 = vld [vmem:[%s1772_s0 + $0x70] sm:$0xff] (%p377_p4) }
  0x15   : > { %407 = vst.msk [vmem:[#allocation3 + $0x20] sm:$0xff] %vm402_vm0, %v390_v4  ;;  %v401_v15 = vld [vmem:[%s1772_s0 + $0x78] sm:$0xff] }
  0x16   : > { %408 = vst.msk [vmem:[#allocation3 + $0x28] sm:$0xff] %vm402_vm0, %v391_v5 }
  0x17   : > { %409 = vst.msk [vmem:[#allocation3 + $0x30] sm:$0xff] %vm402_vm0, %v392_v6 }
  0x18   : > { %410 = vst.msk [vmem:[#allocation3 + $0x38] sm:$0xff] %vm402_vm0, %v393_v7 }
  0x19   : > { %411 = vst.msk [vmem:[#allocation3 + $0x40] sm:$0xff] %vm402_vm0, %v394_v8 }
  0x1a   : > { %412 = vst.msk [vmem:[#allocation3 + $0x48] sm:$0xff] %vm402_vm0, %v395_v9 }
  0x1b   : > { %413 = vst.msk [vmem:[#allocation3 + $0x50] sm:$0xff] %vm402_vm0, %v396_v10 }
  0x1c   : > { %414 = vst.msk [vmem:[#allocation3 + $0x58] sm:$0xff] %vm402_vm0, %v397_v11 }
  0x1d   : > { %415 = vst.msk [vmem:[#allocation3 + $0x60] sm:$0xff] %vm402_vm0, %v398_v12 }
  0x1e   : > { %416 = vst.msk [vmem:[#allocation3 + $0x68] sm:$0xff] %vm402_vm0, %v399_v13 }
  0x1f   : > { %417 = vst.msk [vmem:[#allocation3 + $0x70] sm:$0xff] %vm402_vm0, %v400_v14 }
  0x20   : > { %418 = vst.msk [vmem:[#allocation3 + $0x78] sm:$0xff] %vm402_vm0, %v401_v15 }
  0x21 PF: > { %v447_v16 = vld [vmem:[%s1774_s2] sm:$0xf]  ;;  %vm473_vm1 = vcmask 1043456   ;;  %vm448_vm2 = vcmask 64512   ;;  %v428_v31 = vld [vmem:[#allocation3 + $0x28] sm:$0xff]  ;;  %v429_v36 = vld [vmem:[#allocation3 + $0x30] sm:$0xff] }
  0x22   : > { %v475_v19 = vsel %vm473_vm1, %v447_v16, 0  ;;  %v433_v21 = vld [vmem:[#allocation3 + $0x50] sm:$0xff]  ;;  %v430_v37 = vld [vmem:[#allocation3 + $0x38] sm:$0xff]  ;;  %v431_v39 = vld [vmem:[#allocation3 + $0x40] sm:$0xff]  ;;  %vm542_vm3 = vcmask 60416   ;;  %p1214_p5 = scmp.ne.s32.totalorder %s1362_s29, 1 }
  0x23   : > { %v434_v22 = vld [vmem:[#allocation3 + $0x58] sm:$0xff]  ;;  %484 = vmatpush.bf16.msra.mxu0 %v475_v19  ;;  %1269 = vmatpush.bf16.msra.mxu3 %v475_v19  ;;  %v442_v38 = vpack.c.bf16 %v430_v37, %v429_v36  ;;  %v432_v40 = vld [vmem:[#allocation3 + $0x48] sm:$0xff]  ;;  %v1251_v19 = vld [vmem:[%s1773_s1 + $0x20] sm:$0xff]  ;;  %s1017_s24 = sld [smem:[#allocation5]] (!%p1214_p5) }
  0x24   : > { %v423_v17 = vld [vmem:[#allocation3] sm:$0xff]  ;;  %v444_v23 = vpack.c.bf16 %v434_v22, %v433_v21  ;;  %v443_v41 = vpack.c.bf16 %v432_v40, %v431_v39  ;;  %v1252_v21 = vld [vmem:[%s1773_s1 + $0x28] sm:$0xff]  ;;  %v1372_v22 = vmov 0.0  }
  0x25   : > { %v424_v18 = vld [vmem:[#allocation3 + $0x8] sm:$0xff]  ;;  %v435_v26 = vld [vmem:[#allocation3 + $0x60] sm:$0xff]  ;;  %563 = vst.msk [vmem:[#allocation4] sm:$0xff] %vm448_vm2, %v1372_v22 }
  0x26   : > { %v439_v20 = vpack.c.bf16 %v424_v18, %v423_v17  ;;  %1147 = vmatmul.msk.bf16.vlgmr.msra.gmra.mxu3 %vm448_vm2, %v444_v23  ;;  %v425_v24 = vld [vmem:[#allocation3 + $0x10] sm:$0xff]  ;;  %v436_v27 = vld [vmem:[#allocation3 + $0x68] sm:$0xff]  ;;  %v1247_v18 = vld [vmem:[%s1773_s1] sm:$0xff]  ;;  %564 = vst.msk [vmem:[#allocation4 + $0x8] sm:$0xff] %vm448_vm2, %v1372_v22 }
  0x27   : > { %v426_v25 = vld [vmem:[#allocation3 + $0x18] sm:$0xff]  ;;  %v445_v29 = vpack.c.bf16 %v436_v27, %v435_v26  ;;  %v437_v32 = vld [vmem:[#allocation3 + $0x70] sm:$0xff]  ;;  %565 = vst.msk [vmem:[#allocation4 + $0x10] sm:$0xff] %vm448_vm2, %v1372_v22 }
  0x28   : > { %1142 = vmatmul.msk.bf16.vlgmr.msra.gmra.mxu0 %vm448_vm2, %v439_v20  ;;  %v440_v28 = vpack.c.bf16 %v426_v25, %v425_v24  ;;  %v427_v30 = vld [vmem:[#allocation3 + $0x20] sm:$0xff]  ;;  %v438_v33 = vld [vmem:[#allocation3 + $0x78] sm:$0xff]  ;;  %v1248_v20 = vld [vmem:[%s1773_s1 + $0x8] sm:$0xff]  ;;  %566 = vst.msk [vmem:[#allocation4 + $0x18] sm:$0xff] %vm448_vm2, %v1372_v22 }
  0x29   : > { %v441_v34 = vpack.c.bf16 %v428_v31, %v427_v30  ;;  %v446_v35 = vpack.c.bf16 %v438_v33, %v437_v32  ;;  %567 = vst.msk [vmem:[#allocation4 + $0x20] sm:$0xff] %vm448_vm2, %v1372_v22  ;;  %v1249_v23 = vld [vmem:[%s1773_s1 + $0x10] sm:$0xff]  ;;  %v1250_v25 = vld [vmem:[%s1773_s1 + $0x18] sm:$0xff]  ;;  %v1580_v33 = vld [vmem:[%s1775_s3] ss:$0 sm:$0xff] }
  0x2a   : > { %568 = vst.msk [vmem:[#allocation4 + $0x28] sm:$0xff] %vm448_vm2, %v1372_v22  ;;  %v1253_v24 = vld [vmem:[%s1773_s1 + $0x30] sm:$0xff]  ;;  %v1254_v26 = vld [vmem:[%s1773_s1 + $0x38] sm:$0xff] }
  0x2b   : > { %569 = vst.msk [vmem:[#allocation4 + $0x30] sm:$0xff] %vm448_vm2, %v1372_v22 }
  0x2c   : > { %570 = vst.msk [vmem:[#allocation4 + $0x38] sm:$0xff] %vm448_vm2, %v1372_v22  ;;  %v579_v27 = vld [vmem:[#allocation4] sm:$0xff] }
  0x2d   : > { %571 = vst.msk [vmem:[#allocation4 + $0x40] sm:$0xff] %vm448_vm2, %v1372_v22  ;;  %v580_v32 = vld [vmem:[#allocation4 + $0x8] sm:$0xff] }
  0x2e   : > { %572 = vst.msk [vmem:[#allocation4 + $0x48] sm:$0xff] %vm448_vm2, %v1372_v22 }
  0x2f   : > { %573 = vst.msk [vmem:[#allocation4 + $0x50] sm:$0xff] %vm448_vm2, %v1372_v22 }
  0x30   : > { %574 = vst.msk [vmem:[#allocation4 + $0x58] sm:$0xff] %vm448_vm2, %v1372_v22 }
  0x31   : > { %575 = vst.msk [vmem:[#allocation4 + $0x60] sm:$0xff] %vm448_vm2, %v1372_v22 }
  0x32   : > { %576 = vst.msk [vmem:[#allocation4 + $0x68] sm:$0xff] %vm448_vm2, %v1372_v22 }
  0x33   : > { %577 = vst.msk [vmem:[#allocation4 + $0x70] sm:$0xff] %vm448_vm2, %v1372_v22 }
  0x34   : > { %578 = vst.msk [vmem:[#allocation4 + $0x78] sm:$0xff] %vm448_vm2, %v1372_v22  ;;  %v587_v30 = vld [vmem:[#allocation4 + $0x40] sm:$0xff] }
  0x35   : > { %v588_v39 = vld [vmem:[#allocation4 + $0x48] sm:$0xff] }
  0x36   : > { %1148 = vmatmul.msk.bf16.gmra.mxu3 %vm448_vm2, %v445_v29 }
  0x38   : > { %1143 = vmatmul.msk.bf16.gmra.mxu0 %vm448_vm2, %v440_v28 }
  0x46   : > { %1149 = vmatmul.msk.bf16.gmra.mxu3 %vm448_vm2, %v446_v35 }
  0x48   : > { %1144 = vmatmul.msk.bf16.gmra.mxu0 %vm448_vm2, %v441_v34 }
  0x58   : > { %1145 = vmatmul.msk.bf16.gmra.mxu0 %vm448_vm2, %v442_v38 }
  0x68   : > { %1146 = vmatmul.msk.bf16.gmra.mxu0 %vm448_vm2, %v443_v41  ;;  %v581_v41 = vld [vmem:[#allocation4 + $0x10] sm:$0xff] }
  0xa5   : > { %v486_v42 = vpop.f32.mrf.mxu0 }
  0xa6   : > { %v526_v43 = vpack.c.bf16 %v486_v42, %v486_v42 }
  0xa8   : > { %543 = vst.msk [vmem:[#allocation2] sm:$0xf] %vm542_vm3, %v526_v43 }
  0xa9   : > { %v511_v44 = vpop.f32.mrf.mxu3 }
  0xaa   : > { %v536_v45 = vpack.c.bf16 %v511_v44, %v511_v44 }
  0xac   : > { %553 = vst.msk [vmem:[#allocation2 + $0x28] sm:$0xf] %vm542_vm3, %v536_v45 }
  0xad   : > { %v488_v46 = vpop.f32.mrf.mxu0 }
  0xae   : > { %v527_v47 = vpack.c.bf16 %v488_v46, %v488_v46 }
  0xb0   : > { %544 = vst.msk [vmem:[#allocation2 + $0x4] sm:$0xf] %vm542_vm3, %v527_v47 }
  0xb1   : > { %v513_v48 = vpop.f32.mrf.mxu3 }
  0xb2   : > { %v537_v49 = vpack.c.bf16 %v513_v48, %v513_v48 }
  0xb4   : > { %554 = vst.msk [vmem:[#allocation2 + $0x2c] sm:$0xf] %vm542_vm3, %v537_v49  ;;  %v589_v49 = vld [vmem:[#allocation4 + $0x50] sm:$0xff] }
  0xb5   : > { %v491_v50 = vpop.f32.mrf.mxu0 }
  0xb6   : > { %v528_v51 = vpack.c.bf16 %v491_v50, %v491_v50 }
  0xb7   : > { %v1255_v17 = vld [vmem:[#allocation2] sm:$0xff] }
  0xb8   : > { %545 = vst.msk [vmem:[#allocation2 + $0x8] sm:$0xf] %vm542_vm3, %v528_v51  ;;  %v582_v51 = vld [vmem:[#allocation4 + $0x18] sm:$0xff] }
  0xb9   : > { %v516_v52 = vpop.f32.mrf.mxu3 }
  0xba   : > { %v538_v53 = vpack.c.bf16 %v516_v52, %v516_v52 }
  0xbb   : > { %v1260_v9 = vld [vmem:[#allocation2 + $0x28] sm:$0xff] }
  0xbc   : > { %555 = vst.msk [vmem:[#allocation2 + $0x30] sm:$0xf] %vm542_vm3, %v538_v53 }
  0xbd   : > { %v493_v54 = vpop.f32.mrf.mxu0 }
  0xbe   : > { %v529_v55 = vpack.c.bf16 %v493_v54, %v493_v54 }
  0xc0   : > { %546 = vst.msk [vmem:[#allocation2 + $0xc] sm:$0xf] %vm542_vm3, %v529_v55 }
  0xc1   : > { %v518_v56 = vpop.f32.mrf.mxu3 }
  0xc2   : > { %v539_v57 = vpack.c.bf16 %v518_v56, %v518_v56 }
  0xc4   : > { %556 = vst.msk [vmem:[#allocation2 + $0x34] sm:$0xf] %vm542_vm3, %v539_v57 }
  0xc5   : > { %v496_v58 = vpop.f32.mrf.mxu0 }
  0xc6   : > { %v530_v59 = vpack.c.bf16 %v496_v58, %v496_v58 }
  0xc7   : > { %v1256_v16 = vld [vmem:[#allocation2 + $0x8] sm:$0xff] }
  0xc8   : > { %547 = vst.msk [vmem:[#allocation2 + $0x10] sm:$0xf] %vm542_vm3, %v530_v59  ;;  %v590_v59 = vld [vmem:[#allocation4 + $0x58] sm:$0xff] }
  0xc9   : > { %v521_v60 = vpop.f32.mrf.mxu3 }
  0xca   : > { %v540_v61 = vpack.c.bf16 %v521_v60, %v521_v60 }
  0xcb   : > { %v1261_v7 = vld [vmem:[#allocation2 + $0x30] sm:$0xff] }
  0xcc   : > { %557 = vst.msk [vmem:[#allocation2 + $0x38] sm:$0xf] %vm542_vm3, %v540_v61  ;;  %v583_v61 = vld [vmem:[#allocation4 + $0x20] sm:$0xff] }
  0xcd   : > { %v498_v62 = vpop.f32.mrf.mxu0 }
  0xce   : > { %v531_v63 = vpack.c.bf16 %v498_v62, %v498_v62 }
  0xd0   : > { %548 = vst.msk [vmem:[#allocation2 + $0x14] sm:$0xf] %vm542_vm3, %v531_v63 }
  0xd1   : > { %v523_v0 = vpop.f32.mrf.mxu3 }
  0xd2   : > { %v541_v1 = vpack.c.bf16 %v523_v0, %v523_v0 }
  0xd4   : > { %558 = vst.msk [vmem:[#allocation2 + $0x3c] sm:$0xf] %vm542_vm3, %v541_v1 }
  0xd5   : > { %v501_v2 = vpop.f32.mrf.mxu0 }
  0xd6   : > { %v532_v3 = vpack.c.bf16 %v501_v2, %v501_v2 }
  0xd7   : > { %v1257_v15 = vld [vmem:[#allocation2 + $0x10] sm:$0xff] }
  0xd8   : > { %549 = vst.msk [vmem:[#allocation2 + $0x18] sm:$0xf] %vm542_vm3, %v532_v3 }
  0xdb   : > { %v1262_v5 = vld [vmem:[#allocation2 + $0x38] sm:$0xff] }
  0xdc   : > { %727 = vmatpush.bf16.msra.mxu1 %v1262_v5  ;;  %1270 = vmatpush.bf16.msra.mxu2 %v1262_v5  ;;  %v591_v5 = vld [vmem:[#allocation4 + $0x60] sm:$0xff] }
  0xdd   : > { %v503_v4 = vpop.f32.mrf.mxu0 }
  0xde   : > { %v533_v6 = vpack.c.bf16 %v503_v4, %v503_v4 }
  0xe0   : > { %550 = vst.msk [vmem:[#allocation2 + $0x1c] sm:$0xf] %vm542_vm3, %v533_v6  ;;  %728 = vmatpush.bf16.msra.mxu1 %v1261_v7  ;;  %1271 = vmatpush.bf16.msra.mxu2 %v1261_v7  ;;  %v584_v7 = vld [vmem:[#allocation4 + $0x28] sm:$0xff] }
  0xe4   : > { %729 = vmatpush.bf16.msra.mxu1 %v1260_v9  ;;  %1272 = vmatpush.bf16.msra.mxu2 %v1260_v9 }
  0xe5   : > { %v506_v8 = vpop.f32.mrf.mxu0 }
  0xe6   : > { %v534_v10 = vpack.c.bf16 %v506_v8, %v506_v8 }
  0xe7   : > { %v1258_v14 = vld [vmem:[#allocation2 + $0x18] sm:$0xff] }
  0xe8   : > { %551 = vst.msk [vmem:[#allocation2 + $0x20] sm:$0xf] %vm542_vm3, %v534_v10 }
  0xed   : > { %v508_v11 = vpop.f32.mrf.mxu0 }
  0xee   : > { %v535_v12 = vpack.c.bf16 %v508_v11, %v508_v11 }
  0xf0   : > { %552 = vst.msk [vmem:[#allocation2 + $0x24] sm:$0xf] %vm542_vm3, %v535_v12 }
  0xf7   : > { %v1259_v13 = vld [vmem:[#allocation2 + $0x20] sm:$0xff] }
  0xf8   : > { %730 = vmatpush.bf16.msra.mxu1 %v1259_v13  ;;  %1273 = vmatpush.bf16.msra.mxu2 %v1259_v13 }
  0xfc   : > { %731 = vmatpush.bf16.msra.mxu1 %v1258_v14  ;;  %1274 = vmatpush.bf16.msra.mxu2 %v1258_v14 }
 0x100   : > { %732 = vmatpush.bf16.msra.mxu1 %v1257_v15  ;;  %1275 = vmatpush.bf16.msra.mxu2 %v1257_v15  ;;  %v592_v15 = vld [vmem:[#allocation4 + $0x68] sm:$0xff] }
 0x104   : > { %733 = vmatpush.bf16.msra.mxu1 %v1256_v16  ;;  %1276 = vmatpush.bf16.msra.mxu2 %v1256_v16 }
 0x108   : > { %734 = vmatpush.bf16.msra.mxu1 %v1255_v17  ;;  %1277 = vmatpush.bf16.msra.mxu2 %v1255_v17  ;;  %v585_v17 = vld [vmem:[#allocation4 + $0x30] sm:$0xff] }
 0x10b   : > { %735 = vmatmul.bf16.vlgmr.msra.gmra.mxu1 %v1247_v18  ;;  %755 = vmatmul.bf16.vlgmr.msra.gmra.mxu2 %v1251_v19 }
 0x11b   : > { %740 = vmatmul.bf16.gmra.mxu1 %v1248_v20  ;;  %760 = vmatmul.bf16.gmra.mxu2 %v1252_v21 }
 0x12b   : > { %745 = vmatmul.bf16.gmra.mxu1 %v1249_v23  ;;  %765 = vmatmul.bf16.gmra.mxu2 %v1253_v24 }
 0x13b   : > { %750 = vmatmul.bf16.gmra.mxu1 %v1250_v25  ;;  %770 = vmatmul.bf16.gmra.mxu2 %v1254_v26  ;;  %v593_v25 = vld [vmem:[#allocation4 + $0x70] sm:$0xff] }
 0x188   : > { %v736_v28 = vpop.f32.mrf.mxu1 }
 0x189   : > { %v776_v29 = vadd.f32 %v736_v28, %v579_v27  ;;  %v586_v27 = vld [vmem:[#allocation4 + $0x38] sm:$0xff] }
 0x18b   : > { %793 = vst.msk [vmem:[#allocation4] sm:$0xff] %vm448_vm2, %v776_v29 }
 0x18e   : > { %v756_v31 = vpop.f32.mrf.mxu2 }
 0x18f   : > { %v784_v34 = vadd.f32 %v756_v31, %v587_v30 }
 0x190   : > { %v738_v35 = vpop.f32.mrf.mxu1 }
 0x191   : > { %801 = vst.msk [vmem:[#allocation4 + $0x40] sm:$0xff] %vm448_vm2, %v784_v34  ;;  %v777_v36 = vadd.f32 %v738_v35, %v580_v32 }
 0x192   : > { %v812_v37 = vld [vmem:[#allocation4] sm:$0xff] }
 0x193   : > { %v1584_v38 = vadd.f32 %v1580_v33, %v812_v37  ;;  %794 = vst.msk [vmem:[#allocation4 + $0x8] sm:$0xff] %vm448_vm2, %v777_v36  ;;  %v594_v36 = vld [vmem:[#allocation4 + $0x78] sm:$0xff] }
 0x195   : > { %849 = vst.msk [vmem:[#allocation3] sm:$0xff] %vm448_vm2, %v1584_v38 }
 0x196   : > { %v758_v40 = vpop.f32.mrf.mxu2 }
 0x197   : > { %v785_v42 = vadd.f32 %v758_v40, %v588_v39 }
 0x198   : > { %v820_v43 = vld [vmem:[#allocation4 + $0x40] sm:$0xff]  ;;  %v741_v44 = vpop.f32.mrf.mxu1 }
 0x199   : > { %v1590_v45 = vadd.f32 %v1580_v33, %v820_v43  ;;  %802 = vst.msk [vmem:[#allocation4 + $0x48] sm:$0xff] %vm448_vm2, %v785_v42  ;;  %v778_v46 = vadd.f32 %v741_v44, %v581_v41 }
 0x19a   : > { %v813_v47 = vld [vmem:[#allocation4 + $0x8] sm:$0xff] }
 0x19b   : > { %857 = vst.msk [vmem:[#allocation3 + $0x40] sm:$0xff] %vm448_vm2, %v1590_v45  ;;  %v1596_v48 = vadd.f32 %v1580_v33, %v813_v47 }
 0x19c   : > { %795 = vst.msk [vmem:[#allocation4 + $0x10] sm:$0xff] %vm448_vm2, %v778_v46 }
 0x19d   : > { %850 = vst.msk [vmem:[#allocation3 + $0x8] sm:$0xff] %vm448_vm2, %v1596_v48 }
 0x19e   : > { %v761_v50 = vpop.f32.mrf.mxu2 }
 0x19f   : > { %v786_v52 = vadd.f32 %v761_v50, %v589_v49 }
 0x1a0   : > { %v821_v53 = vld [vmem:[#allocation4 + $0x48] sm:$0xff]  ;;  %v743_v54 = vpop.f32.mrf.mxu1 }
 0x1a1   : > { %v1602_v55 = vadd.f32 %v1580_v33, %v821_v53  ;;  %803 = vst.msk [vmem:[#allocation4 + $0x50] sm:$0xff] %vm448_vm2, %v786_v52  ;;  %v779_v56 = vadd.f32 %v743_v54, %v582_v51 }
 0x1a3   : > { %858 = vst.msk [vmem:[#allocation3 + $0x48] sm:$0xff] %vm448_vm2, %v1602_v55  ;;  %v814_v57 = vld [vmem:[#allocation4 + $0x10] sm:$0xff] }
 0x1a4   : > { %v1608_v58 = vadd.f32 %v1580_v33, %v814_v57  ;;  %796 = vst.msk [vmem:[#allocation4 + $0x18] sm:$0xff] %vm448_vm2, %v779_v56 }
 0x1a6   : > { %851 = vst.msk [vmem:[#allocation3 + $0x10] sm:$0xff] %vm448_vm2, %v1608_v58  ;;  %v763_v60 = vpop.f32.mrf.mxu2 }
 0x1a7   : > { %v787_v62 = vadd.f32 %v763_v60, %v590_v59 }
 0x1a8   : > { %v822_v63 = vld [vmem:[#allocation4 + $0x50] sm:$0xff]  ;;  %v746_v0 = vpop.f32.mrf.mxu1 }
 0x1a9   : > { %v1614_v1 = vadd.f32 %v1580_v33, %v822_v63  ;;  %804 = vst.msk [vmem:[#allocation4 + $0x58] sm:$0xff] %vm448_vm2, %v787_v62  ;;  %v780_v2 = vadd.f32 %v746_v0, %v583_v61 }
 0x1ab   : > { %859 = vst.msk [vmem:[#allocation3 + $0x50] sm:$0xff] %vm448_vm2, %v1614_v1  ;;  %v815_v3 = vld [vmem:[#allocation4 + $0x18] sm:$0xff] }
 0x1ac   : > { %v1620_v4 = vadd.f32 %v1580_v33, %v815_v3  ;;  %797 = vst.msk [vmem:[#allocation4 + $0x20] sm:$0xff] %vm448_vm2, %v780_v2 }
 0x1ae   : > { %852 = vst.msk [vmem:[#allocation3 + $0x18] sm:$0xff] %vm448_vm2, %v1620_v4  ;;  %v766_v6 = vpop.f32.mrf.mxu2 }
 0x1af   : > { %v788_v8 = vadd.f32 %v766_v6, %v591_v5 }
 0x1b0   : > { %v823_v9 = vld [vmem:[#allocation4 + $0x58] sm:$0xff]  ;;  %v748_v10 = vpop.f32.mrf.mxu1 }
 0x1b1   : > { %v1626_v11 = vadd.f32 %v1580_v33, %v823_v9  ;;  %805 = vst.msk [vmem:[#allocation4 + $0x60] sm:$0xff] %vm448_vm2, %v788_v8  ;;  %v781_v12 = vadd.f32 %v748_v10, %v584_v7 }
 0x1b3   : > { %860 = vst.msk [vmem:[#allocation3 + $0x58] sm:$0xff] %vm448_vm2, %v1626_v11  ;;  %v816_v13 = vld [vmem:[#allocation4 + $0x20] sm:$0xff] }
 0x1b4   : > { %v1632_v14 = vadd.f32 %v1580_v33, %v816_v13  ;;  %798 = vst.msk [vmem:[#allocation4 + $0x28] sm:$0xff] %vm448_vm2, %v781_v12 }
 0x1b6   : > { %853 = vst.msk [vmem:[#allocation3 + $0x20] sm:$0xff] %vm448_vm2, %v1632_v14  ;;  %v768_v16 = vpop.f32.mrf.mxu2 }
 0x1b7   : > { %v789_v18 = vadd.f32 %v768_v16, %v592_v15 }
 0x1b8   : > { %v824_v19 = vld [vmem:[#allocation4 + $0x60] sm:$0xff]  ;;  %v751_v20 = vpop.f32.mrf.mxu1 }
 0x1b9   : > { %v844_v21 = vadd.f32 %v1580_v33, %v824_v19  ;;  %806 = vst.msk [vmem:[#allocation4 + $0x68] sm:$0xff] %vm448_vm2, %v789_v18  ;;  %v782_v22 = vadd.f32 %v751_v20, %v585_v17 }
 0x1bb   : > { %861 = vst.msk [vmem:[#allocation3 + $0x60] sm:$0xff] %vm448_vm2, %v844_v21  ;;  %v817_v23 = vld [vmem:[#allocation4 + $0x28] sm:$0xff] }
 0x1bc   : > { %v1641_v24 = vadd.f32 %v1580_v33, %v817_v23  ;;  %799 = vst.msk [vmem:[#allocation4 + $0x30] sm:$0xff] %vm448_vm2, %v782_v22 }
 0x1be   : > { %854 = vst.msk [vmem:[#allocation3 + $0x28] sm:$0xff] %vm448_vm2, %v1641_v24  ;;  %v771_v26 = vpop.f32.mrf.mxu2 }
 0x1bf   : > { %v790_v28 = vadd.f32 %v771_v26, %v593_v25 }
 0x1c0   : > { %v825_v29 = vld [vmem:[#allocation4 + $0x68] sm:$0xff]  ;;  %v753_v30 = vpop.f32.mrf.mxu1 }
 0x1c1   : > { %v845_v31 = vadd.f32 %v1580_v33, %v825_v29  ;;  %807 = vst.msk [vmem:[#allocation4 + $0x70] sm:$0xff] %vm448_vm2, %v790_v28  ;;  %v783_v32 = vadd.f32 %v753_v30, %v586_v27 }
 0x1c3   : > { %862 = vst.msk [vmem:[#allocation3 + $0x68] sm:$0xff] %vm448_vm2, %v845_v31  ;;  %v818_v34 = vld [vmem:[#allocation4 + $0x30] sm:$0xff] }
 0x1c4   : > { %v1650_v35 = vadd.f32 %v1580_v33, %v818_v34  ;;  %800 = vst.msk [vmem:[#allocation4 + $0x38] sm:$0xff] %vm448_vm2, %v783_v32 }
 0x1c6   : > { %855 = vst.msk [vmem:[#allocation3 + $0x30] sm:$0xff] %vm448_vm2, %v1650_v35  ;;  %v773_v37 = vpop.f32.mrf.mxu2 }
 0x1c7   : > { %v791_v39 = vadd.f32 %v773_v37, %v594_v36 }
 0x1c8   : > { %v826_v40 = vld [vmem:[#allocation4 + $0x70] sm:$0xff] }
 0x1c9   : > { %v846_v41 = vadd.f32 %v1580_v33, %v826_v40  ;;  %808 = vst.msk [vmem:[#allocation4 + $0x78] sm:$0xff] %vm448_vm2, %v791_v39 }
 0x1cb   : > { %863 = vst.msk [vmem:[#allocation3 + $0x70] sm:$0xff] %vm448_vm2, %v846_v41  ;;  %v819_v42 = vld [vmem:[#allocation4 + $0x38] sm:$0xff] }
 0x1cc   : > { %v839_v43 = vadd.f32 %v1580_v33, %v819_v42 }
 0x1ce   : > { %856 = vst.msk [vmem:[#allocation3 + $0x38] sm:$0xff] %vm448_vm2, %v839_v43 }
 0x1cf   : > { %868 = sbr.rel (%p1214_p5) target bundleno = 671 (0x29f), region = 72 }
 0x1d0   : > { %v827_v44 = vld [vmem:[#allocation4 + $0x78] sm:$0xff] }
 0x1d1   : > { %v847_v46 = vadd.f32 %v1580_v33, %v827_v44 }
 0x1d3   : > { %864 = vst.msk [vmem:[#allocation3 + $0x78] sm:$0xff] %vm448_vm2, %v847_v46 }
 0x1d4   : > { %v884_v47 = vld [vmem:[%s1772_s0 + $0x70] sm:$0xff]  ;;  %v885_v49 = vld [vmem:[%s1772_s0 + $0x78] sm:$0xff]  ;;  %v882_v50 = vld [vmem:[%s1772_s0 + $0x60] sm:$0xff]  ;;  %vm1000_vm4 = vcmask 785408  }
 0x1d5   : > { %v900_v51 = vsub.f32 %v846_v41, %v884_v47  ;;  %v901_v52 = vsub.f32 %v847_v46, %v885_v49  ;;  %v883_v33 = vld [vmem:[%s1772_s0 + $0x68] sm:$0xff]  ;;  %v898_v54 = vsub.f32 %v844_v21, %v882_v50  ;;  %v1267_v60 = vld [vmem:[%s1778_s6 + $0x20] sm:$0xff]  ;;  %v880_v62 = vld [vmem:[%s1772_s0 + $0x50] sm:$0xff] }
 0x1d6   : > { %v899_v56 = vsub.f32 %v845_v31, %v883_v33  ;;  %v1268_v57 = vld [vmem:[%s1778_s6 + $0x28] sm:$0xff]  ;;  %v881_v63 = vld [vmem:[%s1772_s0 + $0x58] sm:$0xff]  ;;  %v896_v2 = vsub.f32 %v1614_v1, %v880_v62  ;;  %v1265_v6 = vld [vmem:[%s1778_s6 + $0x10] sm:$0xff] }
 0x1d7   : > { %v909_v53 = vpack.c.bf16 %v901_v52, %v900_v51  ;;  %1006 = vmatpush.bf16.msra.mxu1 %v1268_v57  ;;  %v897_v3 = vsub.f32 %v1626_v11, %v881_v63  ;;  %v1266_v5 = vld [vmem:[%s1778_s6 + $0x18] sm:$0xff]  ;;  %v878_v8 = vld [vmem:[%s1772_s0 + $0x40] sm:$0xff]  ;;  %v879_v1 = vld [vmem:[%s1772_s0 + $0x48] sm:$0xff] }
 0x1d8   : > { %v908_v61 = vpack.c.bf16 %v899_v56, %v898_v54  ;;  %v894_v10 = vsub.f32 %v1590_v45, %v878_v8  ;;  %v895_v11 = vsub.f32 %v1602_v55, %v879_v1  ;;  %v1264_v12 = vld [vmem:[%s1778_s6 + $0x8] sm:$0xff]  ;;  %v1263_v13 = vld [vmem:[%s1778_s6] sm:$0xff]  ;;  %v876_v16 = vld [vmem:[%s1772_s0 + $0x30] sm:$0xff] }
 0x1d9   : > { %v936_v59 = vsel %vm448_vm2, %v909_v53, 0  ;;  %v907_v7 = vpack.c.bf16 %v897_v3, %v896_v2  ;;  %v877_v45 = vld [vmem:[%s1772_s0 + $0x38] sm:$0xff]  ;;  %v951_v55 = vld [vmem:[%s1777_s5] sm:$0x1]  ;;  %v892_v18 = vsub.f32 %v1650_v35, %v876_v16  ;;  %v875_v22 = vld [vmem:[%s1772_s0 + $0x28] sm:$0xff] }
 0x1da   : > { %938 = vmatpush.bf16.xpose.msra.mxu0 %v936_v59  ;;  %v933_v0 = vsel %vm448_vm2, %v908_v61, 0  ;;  %v906_v15 = vpack.c.bf16 %v895_v11, %v894_v10  ;;  %v893_v19 = vsub.f32 %v839_v43, %v877_v45  ;;  %v874_v21 = vld [vmem:[%s1772_s0 + $0x20] sm:$0xff]  ;;  %v891_v26 = vsub.f32 %v1641_v24, %v875_v22  ;;  %v872_v28 = vld [vmem:[%s1772_s0 + $0x10] sm:$0xff]  ;;  %v873_v29 = vld [vmem:[%s1772_s0 + $0x18] sm:$0xff] }
 0x1db   : > { %1007 = vmatpush.bf16.msra.mxu1 %v1267_v60  ;;  %v930_v9 = vsel %vm448_vm2, %v907_v7, 0  ;;  %v890_v25 = vsub.f32 %v1632_v14, %v874_v21  ;;  %v888_v31 = vsub.f32 %v1608_v58, %v872_v28  ;;  %v889_v32 = vsub.f32 %v1620_v4, %v873_v29  ;;  %v870_v24 = vld [vmem:[%s1772_s0] sm:$0xff]  ;;  %v871_v34 = vld [vmem:[%s1772_s0 + $0x8] sm:$0xff] }
 0x1dc   : > { %v927_v17 = vsel %vm448_vm2, %v906_v15, 0  ;;  %v905_v20 = vpack.c.bf16 %v893_v19, %v892_v18  ;;  %v886_v36 = vsub.f32 %v1584_v38, %v870_v24  ;;  %v887_v37 = vsub.f32 %v1596_v48, %v871_v34  ;;  %v910_v39 = vld [vmem:[%s1776_s4] sm:$0x1] }
 0x1dd   : > { %v904_v27 = vpack.c.bf16 %v891_v26, %v890_v25  ;;  %v903_v14 = vpack.c.bf16 %v889_v32, %v888_v31  ;;  %v1018_v43 = vstv %s1017_s24 }
 0x1de   : > { %v924_v23 = vsel %vm448_vm2, %v905_v20, 0  ;;  %v902_v58 = vpack.c.bf16 %v887_v37, %v886_v36 }
 0x1df   : > { %1008 = vmatpush.bf16.msra.mxu1 %v1266_v5  ;;  %v921_v30 = vsel %vm448_vm2, %v904_v27, 0  ;;  %v918_v35 = vsel %vm448_vm2, %v903_v14, 0 }
 0x1e0   : > { %v915_v4 = vsel %vm448_vm2, %v902_v58, 0 }
 0x1e2   : > { %939 = vmatpush.bf16.xpose.msra.mxu0 %v933_v0 }
 0x1e3   : > { %1009 = vmatpush.bf16.msra.mxu1 %v1265_v6 }
 0x1e7   : > { %1010 = vmatpush.bf16.msra.mxu1 %v1264_v12 }
 0x1ea   : > { %940 = vmatpush.bf16.xpose.msra.mxu0 %v930_v9 }
 0x1eb   : > { %1011 = vmatpush.bf16.msra.mxu1 %v1263_v13 }
 0x1ee   : > { %1240 = vmatmul.msk.bf16.vlgmr.msra.gmra.mxu1 %vm1000_vm4, %v951_v55 }
 0x1f2   : > { %941 = vmatpush.bf16.xpose.msra.mxu0 %v927_v17 }
 0x1fa   : > { %942 = vmatpush.bf16.xpose.msra.mxu0 %v924_v23 }
 0x202   : > { %943 = vmatpush.bf16.xpose.msra.mxu0 %v921_v30 }
 0x20a   : > { %944 = vmatpush.bf16.xpose.msra.mxu0 %v918_v35 }
 0x212   : > { %945 = vmatpush.bf16.xpose.msra.mxu0 %v915_v4 }
 0x219   : > { %1215 = vmatmul.msk.bf16.vlgmr.msra.gmra.mxu0 %vm448_vm2, %v910_v39 }
 0x26b   : > { %v1013_v40 = vpop.f32.mrf.mxu1 }
 0x273   : > { %v1015_v41 = vpop.f32.mrf.mxu1 }
 0x296   : > { %v947_v42 = vpop.f32.mrf.mxu0 }
 0x297   : > { %v1014_v44 = vadd.f32 %v1013_v40, %v947_v42 }
 0x299   : > { %v1019_v38 = vadd.f32 %v1018_v43, %v1014_v44 }
 0x29b   : > { %1020 = vst [vmem:[#allocation6] sm:$0x3] %v1019_v38 }
 0x29e   : > { %v949_v48 = vpop.f32.mrf.mxu0 }
 0x29f PF: > { %p1286_p6 = scmp.eq.s32.totalorder %s1133_s7, 1  ;;  %s1038_s27 = sshll.u32 %s1780_s8, 4  ;;  %s1039_s27 = int_to_ptr.hbm [resolvable:$true] %s1038_s27 }
 0x2a0   : > { %s1373_s28 = smov [#allocation6]  }
 0x2a1   : > { %s1036_s12 = sshll.u32 %s1373_s28, 4  ;;  %s1037_s12 = int_to_ptr.vmem [resolvable:$true] %s1036_s12 }
 0x2a2   : > { %1279 = dma.vmem_to_hbm [thread:$0]  (%p1286_p6), %s1037_s12, 32, %s1039_s27, [#allocation7]  }
 0x2a3 PF: > { %p1287_p7 = scmp.ge.s32.totalorder %s1370_s9, 2  ;;  %p1288_p8 = scmp.eq.s32.totalorder %s1134_s10, 1 }
 0x2a5   : > { %p1283_p9 = pnand %p1288_p8, %p1287_p7 }
 0x2a7   : > { %p1284_p10 = pneg %p1283_p9 }
 0x2a9   : > { %1357 = dma.done.wait (%p1284_p10), [#allocation7], 32  }
 0x2aa   : > { %1359 = vsyncadd (%p1284_p10), [#allocation7], 4294967264  ;;  %s22_s9 = sadd.s32 1, %s1370_s9   ;;  %s1781_s29 = smov %s1366_s30 }
 0x2ab   : > { %p19_p11 = scmp.ge.s32.totalorder %s22_s9, 4   ;;  %s1782_s30 = smov %s1784_s11 }
 0x2ad   :  { %21 = sbr.rel (!%p19_p11) target bundleno = 5 (0x5), region = 113 }
 0x2b2   :  { %1057 = vsyncpa [#allocation7], 1 }
 0x2b3   :  { %1059 = vsyncpa [#allocation7 + $0x1], 1 }

</bundles_post_ra>
